<compile_context>
chip_gen: v5e
topology: v5e:2x2
jax: 0.10.0
libtpu: 0.0.40
codegen_flags: <defaults>
</compile_context>

<pallas_src>
import jax
import jax.numpy as jnp
from jax.experimental import pallas as pl
from jax.experimental.pallas import tpu as pltpu

_LANES = 128
_SUBLANES = 8
_ROW_BLK = 64            # rows processed per in-kernel block (multiple of 8)
_MAX_TILE_ROWS = 2048    # grid-tile rows cap (1 MiB seg + 1 MiB out per tile)


def _cdiv(a, b):
    return -(-a // b)


def _round_up(x, m):
    return ((x + m - 1) // m) * m


# ----------------------------------------------------------------------------
# Primary kernel: chunked in-register dynamic gather (lane-dense).
# ----------------------------------------------------------------------------
def _gather_take_kernel(seg_ref, vals_ref, out_ref):
    # seg_ref : (tile_rows, 128) int32 superpixel ids
    # vals_ref: (_ROW_BLK, s_pad) f32 value table, rows identical (replicated)
    # out_ref : (tile_rows, 128) f32
    s_pad = vals_ref.shape[1]
    n_chunks = s_pad // _LANES
    n_blocks = seg_ref.shape[0] // _ROW_BLK

    @pl.loop(0, n_blocks)
    def _row_block(r):
        r0 = pl.multiple_of(r * _ROW_BLK, _ROW_BLK)
        seg = seg_ref[pl.ds(r0, _ROW_BLK), :]
        # Hoisted chunk decomposition: computed once per element, not per chunk.
        seg_hi = seg >> 7            # chunk id (negative ids stay negative)
        seg_lo = seg & (_LANES - 1)  # lane index within chunk, always in-bounds

        def chunk_step(c, out):
            off = pl.multiple_of(c * _LANES, _LANES)
            tbl = vals_ref[:, pl.ds(off, _LANES)]          # (_ROW_BLK, 128)
            g = jnp.take_along_axis(tbl, seg_lo, axis=1,
                                    mode="promise_in_bounds")
            return jnp.where(seg_hi == c, g, out)

        out = jnp.zeros((_ROW_BLK, _LANES), jnp.float32)
        if n_chunks <= 8:
            for c in range(n_chunks):                       # static unroll
                out = chunk_step(c, out)
        else:
            out = jax.lax.fori_loop(0, n_chunks, chunk_step, out, unroll=2)

        out_ref[pl.ds(r0, _ROW_BLK), :] = out


def _choose_tiles(rows):
    # >= 4 grid steps (keeps both v7x TensorCores busy, amortizes step
    # overhead) while keeping padded waste small; cap tile at _MAX_TILE_ROWS.
    n_tiles = max(4, _cdiv(rows, _MAX_TILE_ROWS))
    tile_rows = _round_up(_cdiv(rows, n_tiles), _ROW_BLK)
    tile_rows = min(tile_rows, _round_up(max(rows, 1), _ROW_BLK))
    rows_pad = _round_up(max(rows, 1), tile_rows)
    return tile_rows, rows_pad


@jax.jit
def _superpixel2pixel_take(values, segm_img):
    H, W = segm_img.shape
    S = values.shape[0]
    P = H * W

    rows = _cdiv(P, _LANES)
    s_pad = _round_up(S, _LANES)
    tile_rows, rows_pad = _choose_tiles(rows)
    p_pad = rows_pad * _LANES

    seg_flat = segm_img.reshape(-1).astype(jnp.int32)
    if p_pad != P:
        seg_flat = jnp.pad(seg_flat, (0, p_pad - P))
    seg2d = seg_flat.reshape(rows_pad, _LANES)

    vals = values.astype(jnp.float32)
    if s_pad != S:
        vals = jnp.pad(vals, (0, s_pad - S))
    # Row-replicated table so each 128-wide chunk is a direct (ROW_BLK, 128)
    # VMEM load in the kernel (no in-kernel broadcast_to temp). Tiny: 64*s_pad.
    vals_rep = jnp.broadcast_to(vals[None, :], (_ROW_BLK, s_pad))

    out2d = pl.pallas_call(
        _gather_take_kernel,
        out_shape=jax.ShapeDtypeStruct((rows_pad, _LANES), jnp.float32),
        grid=(rows_pad // tile_rows,),
        in_specs=[
            pl.BlockSpec((tile_rows, _LANES), lambda i: (i, 0)),   # seg tile
            pl.BlockSpec((_ROW_BLK, s_pad), lambda i: (0, 0)),     # resident
        ],
        out_specs=pl.BlockSpec((tile_rows, _LANES), lambda i: (i, 0)),
        compiler_params=pltpu.CompilerParams(
            dimension_semantics=("parallel",),
            vmem_limit_bytes=32 * 1024 * 1024),
    )(seg2d, vals_rep)

    if p_pad == P:
        return out2d.reshape(H, W)
    return out2d.reshape(-1)[:P].reshape(H, W)


# ----------------------------------------------------------------------------
# Fallback kernel (exact f32): lane-dense one-hot matmul, K-tiled over S so
# the one-hot intermediate stays tiny (<= 128 x tile_p f32 per chunk).
# Only used if the dynamic-gather lowering is unavailable on this build.
# ----------------------------------------------------------------------------
def _gather_onehot_kernel(seg_ref, vals_ref, out_ref):
    seg = seg_ref[...]                       # (1, tile_p) int32
    s_pad = vals_ref.shape[1]
    tile_p = seg.shape[1]
    acc = jnp.zeros((1, tile_p), jnp.float32)
    for k0 in range(0, s_pad, _LANES):       # K-tiled: 128 superpixels at a time
        sid = jax.lax.broadcasted_iota(jnp.int32, (_LANES, tile_p), 0) + k0
        onehot = (sid == seg).astype(jnp.float32)     # (128, tile_p)
        acc = acc + jnp.dot(vals_ref[:, k0:k0 + _LANES], onehot,
                            preferred_element_type=jnp.float32)
    out_ref[...] = acc


@jax.jit
def _superpixel2pixel_onehot(values, segm_img):
    H, W = segm_img.shape
    S = values.shape[0]
    P = H * W

    s_pad = _round_up(S, _LANES)
    tile_p = 1024
    p_pad = _round_up(P, tile_p)

    seg_row = segm_img.reshape(-1).astype(jnp.int32)
    if p_pad != P:
        seg_row = jnp.pad(seg_row, (0, p_pad - P))
    seg_row = seg_row.reshape(1, p_pad)

    vals_row = values.astype(jnp.float32)
    if s_pad != S:
        vals_row = jnp.pad(vals_row, (0, s_pad - S))
    vals_row = vals_row.reshape(1, s_pad)

    out_row = pl.pallas_call(
        _gather_onehot_kernel,
        out_shape=jax.ShapeDtypeStruct((1, p_pad), jnp.float32),
        grid=(p_pad // tile_p,),
        in_specs=[
            pl.BlockSpec((1, tile_p), lambda i: (0, i)),
            pl.BlockSpec((1, s_pad), lambda i: (0, 0)),
        ],
        out_specs=pl.BlockSpec((1, tile_p), lambda i: (0, i)),
        compiler_params=pltpu.CompilerParams(
            dimension_semantics=("parallel",),
            vmem_limit_bytes=32 * 1024 * 1024),
    )(seg_row, vals_row)

    if p_pad == P:
        return out_row.reshape(H, W)
    return out_row.reshape(-1)[:P].reshape(H, W)


# ----------------------------------------------------------------------------
# Dispatch: probe the dynamic-gather path ONCE (compile + numerics), cache it.
# ----------------------------------------------------------------------------
_PRIMARY_OK = None


def _primary_path_ok():
    global _PRIMARY_OK
    if _PRIMARY_OK is None:
        try:
            seg = (jnp.arange(8 * 16, dtype=jnp.int32) % 5).reshape(8, 16)
            vals = jnp.arange(5, dtype=jnp.float32) * 0.5 + 1.0
            out = jax.block_until_ready(_superpixel2pixel_take(vals, seg))
            ref = vals[seg.reshape(-1)].reshape(8, 16)
            _PRIMARY_OK = bool(jnp.allclose(out, ref, atol=1e-6))
        except Exception:
            _PRIMARY_OK = False
    return _PRIMARY_OK


def superpixel2pixel(values, segm_img):
    """values: (S,) float per-superpixel; segm_img: (H, W) int superpixel ids.
    Returns (H, W) float32 with out[h, w] = values[segm_img[h, w]]."""
    if _primary_path_ok():
        return _superpixel2pixel_take(values, segm_img)
    return _superpixel2pixel_onehot(values, segm_img)


if __name__ == "__main__":
    key = jax.random.PRNGKey(0)
    k_seg, k_val = jax.random.split(key)

    H, W = 16, 16          # spatial size of the segmentation map
    S = 32                 # number of superpixels

    # Module state: segmentation map (held by __init__ in the PyTorch module);
    # forward input: per-superpixel values.
    segm_img = jax.random.randint(k_seg, (H, W), 0, S, dtype=jnp.int32)
    values = jax.random.normal(k_val, (S,), dtype=jnp.float32)

    out = superpixel2pixel(values, segm_img)
    out = jax.block_until_ready(out)

    # Reference: plain JAX gather, identical to PyTorch advanced indexing.
    ref = values[segm_img.reshape(-1)].reshape(H, W)

    assert out.shape == (H, W)
    assert out.dtype == jnp.float32
    assert jnp.allclose(out, ref, atol=1e-6, rtol=1e-6)

    print("KERNEL_OK")
</pallas_src>

<mosaic_0001>
module attributes {stable_mosaic.version = 11 : i64} {
  func.func @_gather_take_kernel(%arg0: i32, %arg1: memref<64x128xi32, #tpu.memory_space<vmem>>, %arg2: memref<64x128xf32, #tpu.memory_space<vmem>>, %arg3: memref<64x128xf32, #tpu.memory_space<vmem>>) attributes {dimension_semantics = [#tpu.dimension_semantics<parallel>], iteration_bounds = array<i64: 1>, scalar_prefetch = 0 : i64, scratch_operands = 0 : i64, tpu.core_type = #tpu.core_type<tc>, window_params = [{transform_indices = @transform_0, window_bounds = array<i64: 64, 128>}, {pipeline_mode = #tpu.pipeline_mode<synchronous>, transform_indices = @transform_1, window_bounds = array<i64: 64, 128>}, {transform_indices = @transform_2, window_bounds = array<i64: 64, 128>}]} {
    %c0_i32 = arith.constant 0 : i32
    %c1_i32 = arith.constant 1 : i32
    %0 = arith.muli %c0_i32, %c1_i32 : i32
    %c0_i32_0 = arith.constant 0 : i32
    %1 = arith.addi %c0_i32_0, %0 : i32
    %c64_i32 = arith.constant 64 : i32
    %2 = arith.muli %1, %c64_i32 : i32
    %3 = tpu.assume_multiple %2, 64 : i32
    %4 = arith.index_cast %3 : i32 to index
    %c0 = arith.constant 0 : index
    %5 = vector.load %arg1[%4, %c0] : memref<64x128xi32, #tpu.memory_space<vmem>>, vector<64x128xi32>
    %c7_i32 = arith.constant 7 : i32
    %6 = vector.broadcast %c7_i32 : i32 to vector<64x128xi32>
    %7 = arith.shrsi %5, %6 : vector<64x128xi32>
    %c127_i32 = arith.constant 127 : i32
    %8 = vector.broadcast %c127_i32 : i32 to vector<64x128xi32>
    %9 = arith.andi %5, %8 : vector<64x128xi32>
    %cst = arith.constant 0.000000e+00 : f32
    %10 = vector.broadcast %cst : f32 to vector<64x128xf32>
    %c0_i32_1 = arith.constant 0 : i32
    %11 = tpu.assume_multiple %c0_i32_1, 128 : i32
    %c0_2 = arith.constant 0 : index
    %12 = arith.index_cast %11 : i32 to index
    %13 = vector.load %arg2[%c0_2, %12] : memref<64x128xf32, #tpu.memory_space<vmem>>, vector<64x128xf32>
    %14 = vector.shape_cast %9 : vector<64x128xi32> to vector<64x128x1xi32>
    %15 = vector.shape_cast %14 : vector<64x128x1xi32> to vector<64x128xi32>
    %16 = tpu.dynamic_gather %13[%15] in [1] : vector<64x128xf32>, vector<64x128xi32> -> vector<64x128xf32>
    %c0_i32_3 = arith.constant 0 : i32
    %17 = vector.broadcast %c0_i32_3 : i32 to vector<64x128xi32>
    %18 = arith.cmpi eq, %7, %17 : vector<64x128xi32>
    %19 = arith.select %18, %16, %10 : vector<64x128xi1>, vector<64x128xf32>
    %20 = arith.index_cast %3 : i32 to index
    %c0_4 = arith.constant 0 : index
    %21 = vector.load %arg3[%20, %c0_4] : memref<64x128xf32, #tpu.memory_space<vmem>>, vector<64x128xf32>
    tpu.vector_store %arg3[%20, %c0_4], %19 {strides = array<i32>} : memref<64x128xf32, #tpu.memory_space<vmem>>, vector<64x128xf32>,
    %c1_i32_5 = arith.constant 1 : i32
    return
  }
  func.func @transform_0(%arg0: i32) -> (i32, i32) {
    %c0_i32 = arith.constant 0 : i32
    %c0_i32_0 = arith.constant 0 : i32
    return %arg0, %c0_i32 : i32, i32
  }
  func.func @transform_1(%arg0: i32) -> (i32, i32) {
    %c0_i32 = arith.constant 0 : i32
    %c0_i32_0 = arith.constant 0 : i32
    %c0_i32_1 = arith.constant 0 : i32
    return %c0_i32, %c0_i32_0 : i32, i32
  }
  func.func @transform_2(%arg0: i32) -> (i32, i32) {
    %c0_i32 = arith.constant 0 : i32
    %c0_i32_0 = arith.constant 0 : i32
    return %arg0, %c0_i32 : i32, i32
  }
}

module attributes {stable_mosaic.version = 11 : i64} {
  func.func @_gather_onehot_kernel(%arg0: i32, %arg1: memref<1x1024xi32, #tpu.memory_space<vmem>>, %arg2: memref<1x128xf32, #tpu.memory_space<vmem>>, %arg3: memref<1x1024xf32, #tpu.memory_space<vmem>>) attributes {dimension_semantics = [#tpu.dimension_semantics<parallel>], iteration_bounds = array<i64: 1>, scalar_prefetch = 0 : i64, scratch_operands = 0 : i64, tpu.core_type = #tpu.core_type<tc>, window_params = [{transform_indices = @transform_0, window_bounds = array<i64: 1, 1024>}, {pipeline_mode = #tpu.pipeline_mode<synchronous>, transform_indices = @transform_1, window_bounds = array<i64: 1, 128>}, {transform_indices = @transform_2, window_bounds = array<i64: 1, 1024>}]} {
    %c0 = arith.constant 0 : index
    %c0_0 = arith.constant 0 : index
    %0 = vector.load %arg1[%c0, %c0_0] : memref<1x1024xi32, #tpu.memory_space<vmem>>, vector<1x1024xi32>
    %cst = arith.constant 0.000000e+00 : f32
    %1 = vector.broadcast %cst : f32 to vector<1x1024xf32>
    %2 = tpu.iota {dimensions = array<i32: 0>} : vector<128x1024xi32>
    %c0_i32 = arith.constant 0 : i32
    %3 = vector.broadcast %c0_i32 : i32 to vector<128x1024xi32>
    %4 = arith.addi %2, %3 : vector<128x1024xi32>
    %5 = vector.broadcast %0 : vector<1x1024xi32> to vector<128x1024xi32>
    %6 = arith.cmpi eq, %4, %5 : vector<128x1024xi32>
    %7 = arith.extui %6 : vector<128x1024xi1> to vector<128x1024xi32>
    %8 = arith.sitofp %7 : vector<128x1024xi32> to vector<128x1024xf32>
    %c0_1 = arith.constant 0 : index
    %c0_2 = arith.constant 0 : index
    %9 = vector.load %arg2[%c0_1, %c0_2] : memref<1x128xf32, #tpu.memory_space<vmem>>, vector<1x128xf32>
    %cst_3 = arith.constant dense<0.000000e+00> : vector<1x1024xf32>
    %10 = tpu.matmul %9, %8, %cst_3 {dimension_numbers = #tpu.dot_dimension_numbers<[1], [0], [0], [1], [0, 0, 1, 1], [], []>} : vector<1x128xf32>, vector<128x1024xf32>, vector<1x1024xf32> -> vector<1x1024xf32>
    %11 = arith.addf %1, %10 : vector<1x1024xf32>
    %c0_4 = arith.constant 0 : index
    %c0_5 = arith.constant 0 : index
    %12 = vector.load %arg3[%c0_4, %c0_5] : memref<1x1024xf32, #tpu.memory_space<vmem>>, vector<1x1024xf32>
    tpu.vector_store %arg3[%c0_4, %c0_5], %11 {strides = array<i32>} : memref<1x1024xf32, #tpu.memory_space<vmem>>, vector<1x1024xf32>,
    return
  }
  func.func @transform_0(%arg0: i32) -> (i32, i32) {
    %c0_i32 = arith.constant 0 : i32
    %c0_i32_0 = arith.constant 0 : i32
    return %c0_i32, %arg0 : i32, i32
  }
  func.func @transform_1(%arg0: i32) -> (i32, i32) {
    %c0_i32 = arith.constant 0 : i32
    %c0_i32_0 = arith.constant 0 : i32
    %c0_i32_1 = arith.constant 0 : i32
    return %c0_i32, %c0_i32_0 : i32, i32
  }
  func.func @transform_2(%arg0: i32) -> (i32, i32) {
    %c0_i32 = arith.constant 0 : i32
    %c0_i32_0 = arith.constant 0 : i32
    return %c0_i32, %arg0 : i32, i32
  }
}

</mosaic_0001>

<bundles_post_ra>
// kernel: _superpixel2pixel_take.1
= control target key start
LH: loop header
LB: loop body
LE: loop exit
PB: predicated region body
PF: predicated region fallthrough
CT: control target
= control target key end

     0   :  { %s191_s0 = inlined_call_operand.vmem [shape: s32[64,128], index: 0, kind: input, shape index: {}]   ;;  %s192_s1 = inlined_call_operand.vmem [shape: f32[64,128], index: 1, kind: input, shape index: {}]   ;;  %s193_s2 = inlined_call_operand.vmem [shape: f32[64,128], index: 2, kind: output, shape index: {}]  }
   0x1   :  { %v13_v0 = vld [vmem:[%s191_s0 + $0x10] sm:$0xff]  ;;  %v11_v2 = vld [vmem:[%s191_s0] sm:$0xff]  ;;  %v14_v9 = vld [vmem:[%s191_s0 + $0x18] sm:$0xff] }
   0x2   :  { %v29_v1 = vand.u32 127, %v13_v0  ;;  %v15_v3 = vld [vmem:[%s191_s0 + $0x20] sm:$0xff]  ;;  %v27_v4 = vand.u32 127, %v11_v2  ;;  %v37_v6 = vld [vmem:[%s192_s1 + $0x10] sm:$0xff]  ;;  %v12_v10 = vld [vmem:[%s191_s0 + $0x8] sm:$0xff]  ;;  %v30_v12 = vand.u32 127, %v14_v9 }
   0x3   :  { %v31_v5 = vand.u32 127, %v15_v3  ;;  %v35_v7 = vld [vmem:[%s192_s1] sm:$0xff]  ;;  %v16_v11 = vld [vmem:[%s191_s0 + $0x28] sm:$0xff]  ;;  %v28_v13 = vand.u32 127, %v12_v10  ;;  %v38_v15 = vld [vmem:[%s192_s1 + $0x18] sm:$0xff]  ;;  %v23_v24 = vshra.s32 %v15_v3, 7 }
   0x4   :  { %97 = vset.pattern.permute.xlu1 %v29_v1  ;;  %95 = vset.pattern.permute.xlu0 %v27_v4  ;;  %v39_v8 = vld [vmem:[%s192_s1 + $0x20] sm:$0xff]  ;;  %v32_v14 = vand.u32 127, %v16_v11  ;;  %v36_v16 = vld [vmem:[%s192_s1 + $0x8] sm:$0xff]  ;;  %v17_v18 = vld [vmem:[%s191_s0 + $0x30] sm:$0xff]  ;;  %v24_v27 = vshra.s32 %v16_v11, 7  ;;  %v21_v29 = vshra.s32 %v13_v0, 7 }
   0x5   :  { %99 = vset.pattern.permute.xlu2 %v31_v5  ;;  %v40_v17 = vld [vmem:[%s192_s1 + $0x28] sm:$0xff]  ;;  %v18_v19 = vld [vmem:[%s191_s0 + $0x38] sm:$0xff]  ;;  %v33_v20 = vand.u32 127, %v17_v18  ;;  %v41_v22 = vld [vmem:[%s192_s1 + $0x30] sm:$0xff]  ;;  %vm71_vm0 = vcmp.eq.s32.totalorder %v23_v24, 0  ;;  %v19_v31 = vshra.s32 %v11_v2, 7 }
   0x6   :  { %v34_v21 = vand.u32 127, %v18_v19  ;;  %v42_v23 = vld [vmem:[%s192_s1 + $0x38] sm:$0xff]  ;;  %vm72_vm1 = vcmp.eq.s32.totalorder %v24_v27, 0  ;;  %vm69_vm2 = vcmp.eq.s32.totalorder %v21_v29, 0  ;;  %v26_v36 = vshra.s32 %v18_v19, 7 }
   0x7   :  { %vm67_vm3 = vcmp.eq.s32.totalorder %v19_v31, 0  ;;  %v22_v38 = vshra.s32 %v14_v9, 7  ;;  %v20_v40 = vshra.s32 %v12_v10, 7  ;;  %v25_v45 = vshra.s32 %v17_v18, 7 }
   0x8   :  { %vm74_vm4 = vcmp.eq.s32.totalorder %v26_v36, 0 }
   0x9   :  { %vm70_vm5 = vcmp.eq.s32.totalorder %v22_v38, 0  ;;  %vm68_vm6 = vcmp.eq.s32.totalorder %v20_v40, 0  ;;  %vm73_vm7 = vcmp.eq.s32.totalorder %v25_v45, 0 }
   0xc   :  { %50 = vperm.xlu1 %97, %v37_v6   ;;  %44 = vperm.xlu0 %95, %v35_v7  }
   0xd   :  { %56 = vperm.xlu2 %99, %v39_v8  }
  0x14   :  { %98 = vset.pattern.permute.xlu1 %v30_v12  ;;  %96 = vset.pattern.permute.xlu0 %v28_v13 }
  0x15   :  { %100 = vset.pattern.permute.xlu2 %v32_v14 }
  0x1c   :  { %53 = vperm.xlu1 %98, %v38_v15   ;;  %47 = vperm.xlu0 %96, %v36_v16  }
  0x1d   :  { %59 = vperm.xlu2 %100, %v40_v17  }
  0x24   :  { %101 = vset.pattern.permute.xlu1 %v33_v20  ;;  %103 = vset.pattern.permute.xlu0 %v34_v21 }
  0x25   :  { %102 = vset.pattern.permute.xlu2 %v34_v21 }
  0x2c   :  { %62 = vperm.xlu1 %101, %v41_v22  }
  0x2d   :  { %65 = vperm.xlu2 %102, %v42_v23  }
  0x67   :  { %v57_v25 = vpop.permute.xlu2 %56 }
  0x68   :  { %v79_v26 = vsel %vm71_vm0, %v57_v25, 0.0 }
  0x69   :  { %87 = vst [vmem:[%s193_s2 + $0x20] sm:$0xff] %v79_v26 }
  0x77   :  { %v60_v28 = vpop.permute.xlu2 %59 }
  0x78   :  { %v80_v30 = vsel %vm72_vm1, %v60_v28, 0.0 }
  0x79   :  { %88 = vst [vmem:[%s193_s2 + $0x28] sm:$0xff] %v80_v30 }
  0x7e   :  { %v51_v32 = vpop.permute.xlu1 %50  ;;  %v45_v34 = vpop.permute.xlu0 %44 }
  0x7f   :  { %v77_v33 = vsel %vm69_vm2, %v51_v32, 0.0  ;;  %v75_v35 = vsel %vm67_vm3, %v45_v34, 0.0 }
  0x80   :  { %85 = vst [vmem:[%s193_s2 + $0x10] sm:$0xff] %v77_v33 }
  0x81   :  { %83 = vst [vmem:[%s193_s2] sm:$0xff] %v75_v35 }
  0x87   :  { %v66_v37 = vpop.permute.xlu2 %65 }
  0x88   :  { %v82_v39 = vsel %vm74_vm4, %v66_v37, 0.0 }
  0x89   :  { %90 = vst [vmem:[%s193_s2 + $0x38] sm:$0xff] %v82_v39 }
  0x8e   :  { %v54_v41 = vpop.permute.xlu1 %53  ;;  %v48_v43 = vpop.permute.xlu0 %47 }
  0x8f   :  { %v78_v42 = vsel %vm70_vm5, %v54_v41, 0.0  ;;  %v76_v44 = vsel %vm68_vm6, %v48_v43, 0.0 }
  0x90   :  { %86 = vst [vmem:[%s193_s2 + $0x18] sm:$0xff] %v78_v42 }
  0x91   :  { %84 = vst [vmem:[%s193_s2 + $0x8] sm:$0xff] %v76_v44 }
  0x9e   :  { %v63_v46 = vpop.permute.xlu1 %62 }
  0x9f   :  { %v81_v47 = vsel %vm73_vm7, %v63_v46, 0.0 }
  0xa0   :  { %89 = vst [vmem:[%s193_s2 + $0x30] sm:$0xff] %v81_v47 }

// kernel: _superpixel2pixel_onehot.1
= control target key start
LH: loop header
LB: loop body
LE: loop exit
PB: predicated region body
PF: predicated region fallthrough
CT: control target
= control target key end

     0   :  { %v12_v0 = vlaneseq  ;;  %v874_v11 = vmov 1.0   ;;  %s1367_s0 = inlined_call_operand.vmem [shape: s32[1,1024], index: 0, kind: input, shape index: {}]   ;;  %s1368_s1 = inlined_call_operand.vmem [shape: f32[1,128], index: 1, kind: input, shape index: {}]   ;;  %s1369_s2 = inlined_call_operand.vmem [shape: f32[1,1024], index: 2, kind: output, shape index: {}]  }
   0x1   :  { %v893_v1 = vld [vmem:[%s1367_s0] sm:$0xff] }
   0x2   :  { %v895_v2 = vshrl.u32 %v12_v0, 7  ;;  %v898_v3 = vperm.slane %v893_v1, 2  ;;  %v901_v4 = vperm.slane %v893_v1, 3  ;;  %v904_v5 = vperm.slane %v893_v1, 0  ;;  %v1264_v27 = vld [vmem:[%s1368_s1] sm:$0x1] }
   0x3   :  { %v916_v9 = vperm.slane %v893_v1, 1  ;;  %v1112_v23 = vperm.slane %v893_v1, 6  ;;  %v1115_v24 = vperm.slane %v893_v1, 7  ;;  %v1138_v25 = vperm.slane %v893_v1, 4 }
   0x4   :  { %v907_v6 = vadd.s32 120, %v895_v2  ;;  %v910_v7 = vadd.s32 112, %v895_v2  ;;  %v913_v8 = vadd.s32 104, %v895_v2  ;;  %v919_v10 = vadd.s32 96, %v895_v2 }
   0x5   :  { %v934_v12 = vadd.s32 88, %v895_v2  ;;  %v958_v13 = vadd.s32 80, %v895_v2  ;;  %v973_v14 = vadd.s32 72, %v895_v2  ;;  %v988_v15 = vadd.s32 64, %v895_v2 }
   0x6   :  { %vm159_vm0 = vcmp.eq.s32.totalorder %v907_v6, %v898_v3  ;;  %vm160_vm1 = vcmp.eq.s32.totalorder %v907_v6, %v901_v4  ;;  %vm151_vm2 = vcmp.eq.s32.totalorder %v910_v7, %v898_v3  ;;  %vm152_vm3 = vcmp.eq.s32.totalorder %v910_v7, %v901_v4 }
   0x7   :  { %777 = vmatpush.msk.msra.mxu2 %vm159_vm0, %v874_v11  ;;  %793 = vmatpush.msk.msra.mxu3 %vm160_vm1, %v874_v11  ;;  %vm157_vm4 = vcmp.eq.s32.totalorder %v907_v6, %v904_v5  ;;  %vm143_vm5 = vcmp.eq.s32.totalorder %v913_v8, %v898_v3  ;;  %vm144_vm6 = vcmp.eq.s32.totalorder %v913_v8, %v901_v4  ;;  %v1003_v16 = vadd.s32 56, %v895_v2 }
   0x8   :  { %745 = vmatpush.msk.msra.mxu0 %vm157_vm4, %v874_v11  ;;  %vm158_vm7 = vcmp.eq.s32.totalorder %v907_v6, %v916_v9  ;;  %vm149_vm8 = vcmp.eq.s32.totalorder %v910_v7, %v904_v5  ;;  %vm150_vm9 = vcmp.eq.s32.totalorder %v910_v7, %v916_v9  ;;  %vm135_vm10 = vcmp.eq.s32.totalorder %v919_v10, %v898_v3 }
   0x9   :  { %778 = vmatpush.msk.msra.mxu2 %vm151_vm2, %v874_v11  ;;  %794 = vmatpush.msk.msra.mxu3 %vm152_vm3, %v874_v11  ;;  %vm136_vm11 = vcmp.eq.s32.totalorder %v919_v10, %v901_v4  ;;  %vm141_vm12 = vcmp.eq.s32.totalorder %v913_v8, %v904_v5  ;;  %vm142_vm13 = vcmp.eq.s32.totalorder %v913_v8, %v916_v9  ;;  %v1018_v17 = vadd.s32 48, %v895_v2 }
   0xa   :  { %761 = vmatpush.msk.msra.mxu1 %vm158_vm7, %v874_v11  ;;  %746 = vmatpush.msk.msra.mxu0 %vm149_vm8, %v874_v11  ;;  %vm133_vm14 = vcmp.eq.s32.totalorder %v919_v10, %v904_v5  ;;  %vm127_vm15 = vcmp.eq.s32.totalorder %v934_v12, %v898_v3  ;;  %vm128_vm0 = vcmp.eq.s32.totalorder %v934_v12, %v901_v4  ;;  %v1033_v18 = vadd.s32 40, %v895_v2 }
   0xb   :  { %779 = vmatpush.msk.msra.mxu2 %vm143_vm5, %v874_v11  ;;  %795 = vmatpush.msk.msra.mxu3 %vm144_vm6, %v874_v11  ;;  %vm134_vm1 = vcmp.eq.s32.totalorder %v919_v10, %v916_v9  ;;  %vm125_vm2 = vcmp.eq.s32.totalorder %v934_v12, %v904_v5  ;;  %vm119_vm3 = vcmp.eq.s32.totalorder %v958_v13, %v898_v3  ;;  %v1048_v19 = vadd.s32 32, %v895_v2 }
   0xc   :  { %762 = vmatpush.msk.msra.mxu1 %vm150_vm9, %v874_v11  ;;  %747 = vmatpush.msk.msra.mxu0 %vm141_vm12, %v874_v11  ;;  %vm120_vm4 = vcmp.eq.s32.totalorder %v958_v13, %v901_v4  ;;  %vm126_vm5 = vcmp.eq.s32.totalorder %v934_v12, %v916_v9  ;;  %vm117_vm6 = vcmp.eq.s32.totalorder %v958_v13, %v904_v5  ;;  %v1063_v20 = vadd.s32 24, %v895_v2 }
   0xd   :  { %780 = vmatpush.msk.msra.mxu2 %vm135_vm10, %v874_v11  ;;  %796 = vmatpush.msk.msra.mxu3 %vm136_vm11, %v874_v11  ;;  %vm111_vm7 = vcmp.eq.s32.totalorder %v973_v14, %v898_v3  ;;  %vm112_vm8 = vcmp.eq.s32.totalorder %v973_v14, %v901_v4  ;;  %vm118_vm9 = vcmp.eq.s32.totalorder %v958_v13, %v916_v9  ;;  %v1078_v21 = vadd.s32 16, %v895_v2 }
   0xe   :  { %763 = vmatpush.msk.msra.mxu1 %vm142_vm13, %v874_v11  ;;  %748 = vmatpush.msk.msra.mxu0 %vm133_vm14, %v874_v11  ;;  %vm109_vm10 = vcmp.eq.s32.totalorder %v973_v14, %v904_v5  ;;  %vm103_vm11 = vcmp.eq.s32.totalorder %v988_v15, %v898_v3  ;;  %vm104_vm12 = vcmp.eq.s32.totalorder %v988_v15, %v901_v4  ;;  %v1093_v22 = vadd.s32 8, %v895_v2 }
   0xf   :  { %781 = vmatpush.msk.msra.mxu2 %vm127_vm15, %v874_v11  ;;  %797 = vmatpush.msk.msra.mxu3 %vm128_vm0, %v874_v11  ;;  %vm110_vm13 = vcmp.eq.s32.totalorder %v973_v14, %v916_v9  ;;  %vm101_vm14 = vcmp.eq.s32.totalorder %v988_v15, %v904_v5  ;;  %vm95_vm15 = vcmp.eq.s32.totalorder %v1003_v16, %v898_v3  ;;  %v1153_v26 = vperm.slane %v893_v1, 5 }
  0x10   :  { %764 = vmatpush.msk.msra.mxu1 %vm134_vm1, %v874_v11  ;;  %749 = vmatpush.msk.msra.mxu0 %vm125_vm2, %v874_v11  ;;  %vm96_vm0 = vcmp.eq.s32.totalorder %v1003_v16, %v901_v4  ;;  %vm102_vm1 = vcmp.eq.s32.totalorder %v988_v15, %v916_v9  ;;  %vm93_vm2 = vcmp.eq.s32.totalorder %v1003_v16, %v904_v5 }
  0x11   :  { %782 = vmatpush.msk.msra.mxu2 %vm119_vm3, %v874_v11  ;;  %798 = vmatpush.msk.msra.mxu3 %vm120_vm4, %v874_v11  ;;  %vm87_vm3 = vcmp.eq.s32.totalorder %v1018_v17, %v898_v3  ;;  %vm88_vm4 = vcmp.eq.s32.totalorder %v1018_v17, %v901_v4 }
  0x12   :  { %765 = vmatpush.msk.msra.mxu1 %vm126_vm5, %v874_v11  ;;  %750 = vmatpush.msk.msra.mxu0 %vm117_vm6, %v874_v11  ;;  %vm94_vm5 = vcmp.eq.s32.totalorder %v1003_v16, %v916_v9  ;;  %vm85_vm6 = vcmp.eq.s32.totalorder %v1018_v17, %v904_v5 }
  0x13   :  { %783 = vmatpush.msk.msra.mxu2 %vm111_vm7, %v874_v11  ;;  %799 = vmatpush.msk.msra.mxu3 %vm112_vm8, %v874_v11  ;;  %vm79_vm7 = vcmp.eq.s32.totalorder %v1033_v18, %v898_v3  ;;  %vm80_vm8 = vcmp.eq.s32.totalorder %v1033_v18, %v901_v4 }
  0x14   :  { %766 = vmatpush.msk.msra.mxu1 %vm118_vm9, %v874_v11  ;;  %751 = vmatpush.msk.msra.mxu0 %vm109_vm10, %v874_v11  ;;  %vm86_vm9 = vcmp.eq.s32.totalorder %v1018_v17, %v916_v9  ;;  %vm77_vm10 = vcmp.eq.s32.totalorder %v1033_v18, %v904_v5 }
  0x15   :  { %784 = vmatpush.msk.msra.mxu2 %vm103_vm11, %v874_v11  ;;  %800 = vmatpush.msk.msra.mxu3 %vm104_vm12, %v874_v11  ;;  %vm71_vm11 = vcmp.eq.s32.totalorder %v1048_v19, %v898_v3  ;;  %vm72_vm12 = vcmp.eq.s32.totalorder %v1048_v19, %v901_v4 }
  0x16   :  { %767 = vmatpush.msk.msra.mxu1 %vm110_vm13, %v874_v11  ;;  %752 = vmatpush.msk.msra.mxu0 %vm101_vm14, %v874_v11  ;;  %vm78_vm13 = vcmp.eq.s32.totalorder %v1033_v18, %v916_v9  ;;  %vm69_vm14 = vcmp.eq.s32.totalorder %v1048_v19, %v904_v5 }
  0x17   :  { %785 = vmatpush.msk.msra.mxu2 %vm95_vm15, %v874_v11  ;;  %801 = vmatpush.msk.msra.mxu3 %vm96_vm0, %v874_v11  ;;  %vm63_vm15 = vcmp.eq.s32.totalorder %v1063_v20, %v898_v3  ;;  %vm64_vm0 = vcmp.eq.s32.totalorder %v1063_v20, %v901_v4 }
  0x18   :  { %768 = vmatpush.msk.msra.mxu1 %vm102_vm1, %v874_v11  ;;  %753 = vmatpush.msk.msra.mxu0 %vm93_vm2, %v874_v11  ;;  %vm70_vm1 = vcmp.eq.s32.totalorder %v1048_v19, %v916_v9  ;;  %vm61_vm2 = vcmp.eq.s32.totalorder %v1063_v20, %v904_v5 }
  0x19   :  { %786 = vmatpush.msk.msra.mxu2 %vm87_vm3, %v874_v11  ;;  %802 = vmatpush.msk.msra.mxu3 %vm88_vm4, %v874_v11  ;;  %vm55_vm3 = vcmp.eq.s32.totalorder %v1078_v21, %v898_v3  ;;  %vm56_vm4 = vcmp.eq.s32.totalorder %v1078_v21, %v901_v4 }
  0x1a   :  { %769 = vmatpush.msk.msra.mxu1 %vm94_vm5, %v874_v11  ;;  %754 = vmatpush.msk.msra.mxu0 %vm85_vm6, %v874_v11  ;;  %vm62_vm5 = vcmp.eq.s32.totalorder %v1063_v20, %v916_v9  ;;  %vm53_vm6 = vcmp.eq.s32.totalorder %v1078_v21, %v904_v5 }
  0x1b   :  { %787 = vmatpush.msk.msra.mxu2 %vm79_vm7, %v874_v11  ;;  %803 = vmatpush.msk.msra.mxu3 %vm80_vm8, %v874_v11  ;;  %vm47_vm7 = vcmp.eq.s32.totalorder %v1093_v22, %v898_v3  ;;  %vm48_vm8 = vcmp.eq.s32.totalorder %v1093_v22, %v901_v4 }
  0x1c   :  { %770 = vmatpush.msk.msra.mxu1 %vm86_vm9, %v874_v11  ;;  %755 = vmatpush.msk.msra.mxu0 %vm77_vm10, %v874_v11  ;;  %vm54_vm9 = vcmp.eq.s32.totalorder %v1078_v21, %v916_v9  ;;  %vm45_vm10 = vcmp.eq.s32.totalorder %v1093_v22, %v904_v5 }
  0x1d   :  { %788 = vmatpush.msk.msra.mxu2 %vm71_vm11, %v874_v11  ;;  %804 = vmatpush.msk.msra.mxu3 %vm72_vm12, %v874_v11  ;;  %vm39_vm11 = vcmp.eq.s32.totalorder %v895_v2, %v898_v3  ;;  %vm40_vm12 = vcmp.eq.s32.totalorder %v895_v2, %v901_v4 }
  0x1e   :  { %771 = vmatpush.msk.msra.mxu1 %vm78_vm13, %v874_v11  ;;  %756 = vmatpush.msk.msra.mxu0 %vm69_vm14, %v874_v11  ;;  %vm163_vm13 = vcmp.eq.s32.totalorder %v907_v6, %v1112_v23  ;;  %vm164_vm14 = vcmp.eq.s32.totalorder %v907_v6, %v1115_v24 }
  0x1f   :  { %789 = vmatpush.msk.msra.mxu2 %vm63_vm15, %v874_v11  ;;  %805 = vmatpush.msk.msra.mxu3 %vm64_vm0, %v874_v11  ;;  %vm46_vm15 = vcmp.eq.s32.totalorder %v1093_v22, %v916_v9  ;;  %vm37_vm0 = vcmp.eq.s32.totalorder %v895_v2, %v904_v5 }
  0x20   :  { %772 = vmatpush.msk.msra.mxu1 %vm70_vm1, %v874_v11  ;;  %757 = vmatpush.msk.msra.mxu0 %vm61_vm2, %v874_v11  ;;  %vm155_vm1 = vcmp.eq.s32.totalorder %v910_v7, %v1112_v23  ;;  %vm156_vm2 = vcmp.eq.s32.totalorder %v910_v7, %v1115_v24 }
  0x21   :  { %790 = vmatpush.msk.msra.mxu2 %vm55_vm3, %v874_v11  ;;  %806 = vmatpush.msk.msra.mxu3 %vm56_vm4, %v874_v11  ;;  %vm38_vm3 = vcmp.eq.s32.totalorder %v895_v2, %v916_v9  ;;  %vm161_vm4 = vcmp.eq.s32.totalorder %v907_v6, %v1138_v25 }
  0x22   :  { %773 = vmatpush.msk.msra.mxu1 %vm62_vm5, %v874_v11  ;;  %758 = vmatpush.msk.msra.mxu0 %vm53_vm6, %v874_v11  ;;  %vm147_vm5 = vcmp.eq.s32.totalorder %v913_v8, %v1112_v23  ;;  %vm148_vm6 = vcmp.eq.s32.totalorder %v913_v8, %v1115_v24 }
  0x23   :  { %791 = vmatpush.msk.msra.mxu2 %vm47_vm7, %v874_v11  ;;  %807 = vmatpush.msk.msra.mxu3 %vm48_vm8, %v874_v11  ;;  %vm162_vm7 = vcmp.eq.s32.totalorder %v907_v6, %v1153_v26  ;;  %vm153_vm8 = vcmp.eq.s32.totalorder %v910_v7, %v1138_v25 }
  0x24   :  { %774 = vmatpush.msk.msra.mxu1 %vm54_vm9, %v874_v11  ;;  %759 = vmatpush.msk.msra.mxu0 %vm45_vm10, %v874_v11  ;;  %vm139_vm9 = vcmp.eq.s32.totalorder %v919_v10, %v1112_v23  ;;  %vm140_vm10 = vcmp.eq.s32.totalorder %v919_v10, %v1115_v24 }
  0x25   :  { %792 = vmatpush.msk.msra.mxu2 %vm39_vm11, %v874_v11  ;;  %808 = vmatpush.msk.msra.mxu3 %vm40_vm12, %v874_v11  ;;  %vm154_vm11 = vcmp.eq.s32.totalorder %v910_v7, %v1153_v26  ;;  %vm145_vm12 = vcmp.eq.s32.totalorder %v913_v8, %v1138_v25 }
  0x26   :  { %775 = vmatpush.msk.msra.mxu1 %vm46_vm15, %v874_v11  ;;  %760 = vmatpush.msk.msra.mxu0 %vm37_vm0, %v874_v11  ;;  %vm146_vm15 = vcmp.eq.s32.totalorder %v913_v8, %v1153_v26  ;;  %vm137_vm0 = vcmp.eq.s32.totalorder %v919_v10, %v1138_v25 }
  0x27   :  { %841 = vmatpush.msk.msrb.mxu2 %vm163_vm13, %v874_v11  ;;  %857 = vmatpush.msk.msrb.mxu3 %vm164_vm14, %v874_v11  ;;  %vm131_vm13 = vcmp.eq.s32.totalorder %v934_v12, %v1112_v23  ;;  %vm132_vm14 = vcmp.eq.s32.totalorder %v934_v12, %v1115_v24 }
  0x28   :  { %776 = vmatpush.msk.msra.mxu1 %vm38_vm3, %v874_v11  ;;  %809 = vmatpush.msk.msrb.mxu0 %vm161_vm4, %v874_v11  ;;  %vm138_vm3 = vcmp.eq.s32.totalorder %v919_v10, %v1153_v26  ;;  %vm129_vm4 = vcmp.eq.s32.totalorder %v934_v12, %v1138_v25 }
  0x29   :  { %842 = vmatpush.msk.msrb.mxu2 %vm155_vm1, %v874_v11  ;;  %858 = vmatpush.msk.msrb.mxu3 %vm156_vm2, %v874_v11  ;;  %vm123_vm1 = vcmp.eq.s32.totalorder %v958_v13, %v1112_v23  ;;  %vm124_vm2 = vcmp.eq.s32.totalorder %v958_v13, %v1115_v24 }
  0x2a   :  { %825 = vmatpush.msk.msrb.mxu1 %vm162_vm7, %v874_v11  ;;  %810 = vmatpush.msk.msrb.mxu0 %vm153_vm8, %v874_v11  ;;  %vm130_vm7 = vcmp.eq.s32.totalorder %v934_v12, %v1153_v26  ;;  %vm121_vm8 = vcmp.eq.s32.totalorder %v958_v13, %v1138_v25 }
  0x2b   :  { %843 = vmatpush.msk.msrb.mxu2 %vm147_vm5, %v874_v11  ;;  %859 = vmatpush.msk.msrb.mxu3 %vm148_vm6, %v874_v11  ;;  %vm115_vm5 = vcmp.eq.s32.totalorder %v973_v14, %v1112_v23  ;;  %vm116_vm6 = vcmp.eq.s32.totalorder %v973_v14, %v1115_v24 }
  0x2c   :  { %826 = vmatpush.msk.msrb.mxu1 %vm154_vm11, %v874_v11  ;;  %811 = vmatpush.msk.msrb.mxu0 %vm145_vm12, %v874_v11  ;;  %vm122_vm11 = vcmp.eq.s32.totalorder %v958_v13, %v1153_v26  ;;  %vm113_vm12 = vcmp.eq.s32.totalorder %v973_v14, %v1138_v25 }
  0x2d   :  { %844 = vmatpush.msk.msrb.mxu2 %vm139_vm9, %v874_v11  ;;  %860 = vmatpush.msk.msrb.mxu3 %vm140_vm10, %v874_v11  ;;  %vm107_vm9 = vcmp.eq.s32.totalorder %v988_v15, %v1112_v23  ;;  %vm108_vm10 = vcmp.eq.s32.totalorder %v988_v15, %v1115_v24 }
  0x2e   :  { %827 = vmatpush.msk.msrb.mxu1 %vm146_vm15, %v874_v11  ;;  %812 = vmatpush.msk.msrb.mxu0 %vm137_vm0, %v874_v11  ;;  %vm114_vm15 = vcmp.eq.s32.totalorder %v973_v14, %v1153_v26  ;;  %vm105_vm0 = vcmp.eq.s32.totalorder %v988_v15, %v1138_v25 }
  0x2f   :  { %845 = vmatpush.msk.msrb.mxu2 %vm131_vm13, %v874_v11  ;;  %861 = vmatpush.msk.msrb.mxu3 %vm132_vm14, %v874_v11  ;;  %vm99_vm13 = vcmp.eq.s32.totalorder %v1003_v16, %v1112_v23  ;;  %vm100_vm14 = vcmp.eq.s32.totalorder %v1003_v16, %v1115_v24 }
  0x30   :  { %828 = vmatpush.msk.msrb.mxu1 %vm138_vm3, %v874_v11  ;;  %813 = vmatpush.msk.msrb.mxu0 %vm129_vm4, %v874_v11  ;;  %vm106_vm3 = vcmp.eq.s32.totalorder %v988_v15, %v1153_v26  ;;  %vm83_vm4 = vcmp.eq.s32.totalorder %v1033_v18, %v1112_v23 }
  0x31   :  { %846 = vmatpush.msk.msrb.mxu2 %vm123_vm1, %v874_v11  ;;  %862 = vmatpush.msk.msrb.mxu3 %vm124_vm2, %v874_v11  ;;  %vm91_vm1 = vcmp.eq.s32.totalorder %v1018_v17, %v1112_v23  ;;  %vm92_vm2 = vcmp.eq.s32.totalorder %v1018_v17, %v1115_v24 }
  0x32   :  { %829 = vmatpush.msk.msrb.mxu1 %vm130_vm7, %v874_v11  ;;  %814 = vmatpush.msk.msrb.mxu0 %vm121_vm8, %v874_v11  ;;  %vm98_vm7 = vcmp.eq.s32.totalorder %v1003_v16, %v1153_v26  ;;  %vm75_vm8 = vcmp.eq.s32.totalorder %v1048_v19, %v1112_v23 }
  0x33   :  { %847 = vmatpush.msk.msrb.mxu2 %vm115_vm5, %v874_v11  ;;  %863 = vmatpush.msk.msrb.mxu3 %vm116_vm6, %v874_v11  ;;  %vm84_vm5 = vcmp.eq.s32.totalorder %v1033_v18, %v1115_v24  ;;  %vm97_vm6 = vcmp.eq.s32.totalorder %v1003_v16, %v1138_v25 }
  0x34   :  { %830 = vmatpush.msk.msrb.mxu1 %vm122_vm11, %v874_v11  ;;  %815 = vmatpush.msk.msrb.mxu0 %vm113_vm12, %v874_v11  ;;  %vm90_vm11 = vcmp.eq.s32.totalorder %v1018_v17, %v1153_v26  ;;  %vm67_vm12 = vcmp.eq.s32.totalorder %v1063_v20, %v1112_v23 }
  0x35   :  { %848 = vmatpush.msk.msrb.mxu2 %vm107_vm9, %v874_v11  ;;  %864 = vmatpush.msk.msrb.mxu3 %vm108_vm10, %v874_v11  ;;  %vm76_vm9 = vcmp.eq.s32.totalorder %v1048_v19, %v1115_v24  ;;  %vm89_vm10 = vcmp.eq.s32.totalorder %v1018_v17, %v1138_v25 }
  0x36   :  { %831 = vmatpush.msk.msrb.mxu1 %vm114_vm15, %v874_v11  ;;  %816 = vmatpush.msk.msrb.mxu0 %vm105_vm0, %v874_v11  ;;  %vm82_vm15 = vcmp.eq.s32.totalorder %v1033_v18, %v1153_v26  ;;  %vm59_vm0 = vcmp.eq.s32.totalorder %v1078_v21, %v1112_v23 }
  0x37   :  { %849 = vmatpush.msk.msrb.mxu2 %vm99_vm13, %v874_v11  ;;  %865 = vmatpush.msk.msrb.mxu3 %vm100_vm14, %v874_v11  ;;  %vm68_vm13 = vcmp.eq.s32.totalorder %v1063_v20, %v1115_v24  ;;  %vm81_vm14 = vcmp.eq.s32.totalorder %v1033_v18, %v1138_v25 }
  0x38   :  { %832 = vmatpush.msk.msrb.mxu1 %vm106_vm3, %v874_v11  ;;  %478 = vmatmul.f32.vlgmr.msra.gmra.mxu2 %v1264_v27  ;;  %vm74_vm3 = vcmp.eq.s32.totalorder %v1048_v19, %v1153_v26 }
  0x39   :  { %850 = vmatpush.msk.msrb.mxu2 %vm91_vm1, %v874_v11  ;;  %866 = vmatpush.msk.msrb.mxu3 %vm92_vm2, %v874_v11  ;;  %vm60_vm1 = vcmp.eq.s32.totalorder %v1078_v21, %v1115_v24  ;;  %vm73_vm2 = vcmp.eq.s32.totalorder %v1048_v19, %v1138_v25 }
  0x3a   :  { %498 = vmatmul.f32.vlgmr.msra.gmra.mxu3 %v1264_v27  ;;  %817 = vmatpush.msk.msrb.mxu0 %vm97_vm6, %v874_v11  ;;  %vm66_vm6 = vcmp.eq.s32.totalorder %v1063_v20, %v1153_v26 }
  0x3b   :  { %851 = vmatpush.msk.msrb.mxu2 %vm83_vm4, %v874_v11  ;;  %867 = vmatpush.msk.msrb.mxu3 %vm84_vm5, %v874_v11  ;;  %vm51_vm4 = vcmp.eq.s32.totalorder %v1093_v22, %v1112_v23  ;;  %vm52_vm5 = vcmp.eq.s32.totalorder %v1093_v22, %v1115_v24 }
  0x3c   :  { %833 = vmatpush.msk.msrb.mxu1 %vm98_vm7, %v874_v11  ;;  %818 = vmatpush.msk.msrb.mxu0 %vm89_vm10, %v874_v11  ;;  %vm65_vm7 = vcmp.eq.s32.totalorder %v1063_v20, %v1138_v25  ;;  %vm57_vm10 = vcmp.eq.s32.totalorder %v1078_v21, %v1138_v25 }
  0x3d   :  { %852 = vmatpush.msk.msrb.mxu2 %vm75_vm8, %v874_v11  ;;  %868 = vmatpush.msk.msrb.mxu3 %vm76_vm9, %v874_v11  ;;  %vm43_vm8 = vcmp.eq.s32.totalorder %v895_v2, %v1112_v23  ;;  %vm44_vm9 = vcmp.eq.s32.totalorder %v895_v2, %v1115_v24 }
  0x3e   :  { %834 = vmatpush.msk.msrb.mxu1 %vm90_vm11, %v874_v11  ;;  %819 = vmatpush.msk.msrb.mxu0 %vm81_vm14, %v874_v11  ;;  %vm58_vm11 = vcmp.eq.s32.totalorder %v1078_v21, %v1153_v26  ;;  %vm41_vm14 = vcmp.eq.s32.totalorder %v895_v2, %v1138_v25 }
  0x3f   :  { %853 = vmatpush.msk.msrb.mxu2 %vm67_vm12, %v874_v11  ;;  %869 = vmatpush.msk.msrb.mxu3 %vm68_vm13, %v874_v11  ;;  %vm49_vm12 = vcmp.eq.s32.totalorder %v1093_v22, %v1138_v25  ;;  %vm50_vm13 = vcmp.eq.s32.totalorder %v1093_v22, %v1153_v26 }
  0x40   :  { %835 = vmatpush.msk.msrb.mxu1 %vm82_vm15, %v874_v11  ;;  %820 = vmatpush.msk.msrb.mxu0 %vm73_vm2, %v874_v11  ;;  %vm42_vm15 = vcmp.eq.s32.totalorder %v895_v2, %v1153_v26  ;;  %vm601_vm2 = vcmask 1041408  }
  0x41   :  { %854 = vmatpush.msk.msrb.mxu2 %vm59_vm0, %v874_v11  ;;  %870 = vmatpush.msk.msrb.mxu3 %vm60_vm1, %v874_v11  ;;  %vm599_vm0 = vcmask 1042434   ;;  %vm597_vm1 = vcmask 1040384  }
  0x42   :  { %458 = vmatmul.f32.vlgmr.msra.gmra.mxu1 %v1264_v27  ;;  %438 = vmatmul.f32.vlgmr.msra.gmra.mxu0 %v1264_v27 }
  0x43   :  { %836 = vmatpush.msk.msrb.mxu1 %vm74_vm3, %v874_v11  ;;  %855 = vmatpush.msk.msrb.mxu2 %vm51_vm4, %v874_v11  ;;  %vm603_vm3 = vcmask 1044484   ;;  %vm605_vm4 = vcmask 1046534  }
  0x44   :  { %871 = vmatpush.msk.msrb.mxu3 %vm52_vm5, %v874_v11  ;;  %821 = vmatpush.msk.msrb.mxu0 %vm65_vm7, %v874_v11  ;;  %vm607_vm5 = vcmask 1045508  }
  0x45   :  { %837 = vmatpush.msk.msrb.mxu1 %vm66_vm6, %v874_v11  ;;  %856 = vmatpush.msk.msrb.mxu2 %vm43_vm8, %v874_v11  ;;  %vm609_vm6 = vcmask 1043456  }
  0x46   :  { %872 = vmatpush.msk.msrb.mxu3 %vm44_vm9, %v874_v11  ;;  %558 = vmatmul.f32.vlgmr.msrb.gmra.mxu2 %v1264_v27 }
  0x47   :  { %578 = vmatmul.f32.vlgmr.msrb.gmra.mxu3 %v1264_v27  ;;  %822 = vmatpush.msk.msrb.mxu0 %vm57_vm10, %v874_v11 }
  0x48   :  { %838 = vmatpush.msk.msrb.mxu1 %vm58_vm11, %v874_v11 }
  0x49   :  { %823 = vmatpush.msk.msrb.mxu0 %vm49_vm12, %v874_v11 }
  0x4a   :  { %839 = vmatpush.msk.msrb.mxu1 %vm50_vm13, %v874_v11 }
  0x4b   :  { %824 = vmatpush.msk.msrb.mxu0 %vm41_vm14, %v874_v11 }
  0x4c   :  { %840 = vmatpush.msk.msrb.mxu1 %vm42_vm15, %v874_v11  ;;  %518 = vmatmul.f32.vlgmr.msrb.gmra.mxu0 %v1264_v27 }
  0x4d   :  { %538 = vmatmul.f32.vlgmr.msrb.gmra.mxu1 %v1264_v27 }
  0xbb   :  { %v479_v28 = vpop.f32.mrf.mxu2 }
  0xbc   :  { %v591_v33 = vrot.slane %v479_v28, 6 }
  0xbd   :  { %v499_v31 = vpop.f32.mrf.mxu3 }
  0xbe   :  { %v592_v34 = vrot.slane %v499_v31, 5 }
  0xbf   :  { %v439_v29 = vpop.f32.mrf.mxu0  ;;  %v459_v30 = vpop.f32.mrf.mxu1 }
  0xc0   :  { %v590_v32 = vrot.slane %v459_v30, 7  ;;  %v600_v41 = vsel %vm599_vm0, %v591_v33, %v592_v34 }
  0xc2   :  { %v598_v42 = vsel %vm597_vm1, %v439_v29, %v590_v32 }
  0xc3   :  { %v602_v47 = vsel %vm601_vm2, %v598_v42, %v600_v41 }
  0xc9   :  { %v519_v35 = vpop.f32.mrf.mxu0  ;;  %v559_v36 = vpop.f32.mrf.mxu2 }
  0xca   :  { %v593_v37 = vrot.slane %v519_v35, 4  ;;  %v539_v38 = vpop.f32.mrf.mxu1  ;;  %v595_v39 = vrot.slane %v559_v36, 2  ;;  %v579_v40 = vpop.f32.mrf.mxu3 }
  0xcb   :  { %v594_v43 = vrot.slane %v539_v38, 3  ;;  %v596_v44 = vrot.slane %v579_v40, 1 }
  0xcd   :  { %v604_v45 = vsel %vm603_vm3, %v593_v37, %v594_v43  ;;  %v606_v46 = vsel %vm605_vm4, %v595_v39, %v596_v44 }
  0xce   :  { %v608_v48 = vsel %vm607_vm5, %v604_v45, %v606_v46 }
  0xcf   :  { %v610_v49 = vsel %vm609_vm6, %v602_v47, %v608_v48 }
  0xd0   :  { %612 = vst [vmem:[%s1369_s2] sm:$0xff] %v610_v49 }

</bundles_post_ra>
